<compile_context>
chip_gen: v7x
topology: tpu7x:2x2x1
jax: 0.10.0
libtpu: 0.0.40
codegen_flags: <defaults>
</compile_context>

<pallas_src>
import functools

import jax
import jax.numpy as jnp
from jax.experimental import pallas as pl
from jax.experimental.pallas import tpu as pltpu


def planar_flow_kernel(scal_ref, w_ref, u_ref, x_ref, out_ref, logdet_ref):
    # scal_ref: (2,) f32 in SMEM -> [bias, coef] (grid-invariant, hoisted).
    bias = scal_ref[0]
    coef = scal_ref[1]

    x = x_ref[...].astype(jnp.float32)   # (tb, D)
    w = w_ref[...].astype(jnp.float32)   # (1, D)
    u = u_ref[...].astype(jnp.float32)   # (1, D)

    # w^T x + b  (per-row reduction over the feature/lane axis -> XLU)
    wxb = jnp.sum(x * w, axis=-1, keepdims=True) + bias      # (tb, 1)
    hx = jnp.tanh(wxb)                                        # (tb, 1)
    dhx = 1.0 - hx * hx                                       # sech^2 = 1 - tanh^2

    out_ref[...] = (x + u * hx).astype(out_ref.dtype)                       # (tb, D)
    logdet_ref[...] = jnp.log(jnp.abs(1.0 + coef * dhx)).astype(logdet_ref.dtype)


def _pick_block_b(B, D, itemsize=4, tile_budget_bytes=24 << 20):
    """Largest batch tile (multiple of 8, divides B) fitting a conservative
    VMEM budget: double-buffered x-in + out tiles ~ 4 * block_b * D * itemsize.
    Keeps >= 2 grid steps when possible so v7x's second TensorCore is used."""
    cap = max(8, (tile_budget_bytes // (4 * D * itemsize)) // 8 * 8)
    block_b = min(B, cap, 1024)
    block_b = max(8, (block_b // 8) * 8)
    while B % block_b:
        block_b -= 8
    if B // block_b < 2 and B >= 16:
        half = (B // 2) // 8 * 8
        while half >= 8 and B % half:
            half -= 8
        if half >= 8:
            block_b = half
    return block_b


@functools.partial(jax.jit, static_argnames=("block_b",))
def _planar_flow_call(scalars, projection, direction, x, *, block_b):
    B, D = x.shape
    itemsize = x.dtype.itemsize
    grid = (B // block_b,)

    cost = pl.CostEstimate(
        flops=4 * B * D + 6 * B,
        transcendentals=2 * B,                                    # tanh + log per row
        bytes_accessed=2 * B * D * itemsize + B * itemsize + 2 * D * 4 + 8,
    )

    out, logdet = pl.pallas_call(
        planar_flow_kernel,
        out_shape=(
            jax.ShapeDtypeStruct((B, D), x.dtype),
            jax.ShapeDtypeStruct((B, 1), x.dtype),
        ),
        grid_spec=pltpu.PrefetchScalarGridSpec(
            num_scalar_prefetch=1,                                 # [bias, coef] -> SMEM
            grid=grid,
            in_specs=[
                pl.BlockSpec((1, D), lambda i, s: (0, 0)),         # projection (w)
                pl.BlockSpec((1, D), lambda i, s: (0, 0)),         # direction (u)
                pl.BlockSpec((block_b, D), lambda i, s: (i, 0)),   # x
            ],
            out_specs=[
                pl.BlockSpec((block_b, D), lambda i, s: (i, 0)),   # out
                pl.BlockSpec((block_b, 1), lambda i, s: (i, 0)),   # logdet
            ],
        ),
        compiler_params=pltpu.CompilerParams(
            dimension_semantics=("parallel",),
            vmem_limit_bytes=32 * 1024 * 1024,   # safe on v5e/v6e/v7x, >= v5e default
        ),
        cost_estimate=cost,
    )(scalars, projection, direction, x)
    return out, logdet


def planar_flow(x, projection, direction, bias):
    B, D = x.shape
    assert B % 8 == 0, "batch must be a multiple of 8"
    block_b = _pick_block_b(B, D, x.dtype.itemsize)
    # Hoist grid-invariant scalars: bias and coef = sum(w * u).
    coef = jnp.sum(projection.astype(jnp.float32) * direction.astype(jnp.float32))
    scalars = jnp.stack([bias.reshape(()).astype(jnp.float32), coef])   # (2,) f32
    return _planar_flow_call(scalars, projection, direction, x, block_b=block_b)


def init_planar_params(input_dim, seed=1234):
    """Deterministic xavier-normal init mirroring the PyTorch __init__ + modify()."""
    key = jax.random.PRNGKey(seed)
    k_u, k_w = jax.random.split(key)
    std = (2.0 / (1.0 + input_dim)) ** 0.5
    direction = std * jax.random.normal(k_u, (1, input_dim), jnp.float32)
    projection = std * jax.random.normal(k_w, (1, input_dim), jnp.float32)
    bias = jnp.zeros((1,), jnp.float32)

    # modify(): ensure invertibility (u^T w > -1)
    coef = float(jnp.sum(projection * direction))
    if coef <= -1.0:
        m_coef = -1.0 + float(jnp.log(1.0 + jnp.exp(coef)))
        unit_proj = projection / jnp.sqrt(jnp.sum(projection ** 2))
        direction = direction + (m_coef - coef) * unit_proj
    return projection, direction, bias


def planar_flow_ref(x, projection, direction, bias):
    wxb = jnp.sum(x * projection, axis=-1, keepdims=True) + bias
    hx = jnp.tanh(wxb)
    dhx = 1.0 / jnp.cosh(wxb) ** 2
    coef = jnp.sum(projection * direction, axis=-1, keepdims=True)
    out = x + direction * hx
    logdet = jnp.log(jnp.abs(1.0 + dhx * coef))
    return out, logdet


if __name__ == "__main__":
    B, D = 64, 128  # batch, input_dim (small, lane-aligned feature dim)

    projection, direction, bias = init_planar_params(D)
    x = jax.random.normal(jax.random.PRNGKey(0), (B, D), jnp.float32)

    out, logdet = planar_flow(x, projection, direction, bias)
    jax.block_until_ready((out, logdet))

    out_ref, logdet_ref = planar_flow_ref(x, projection, direction, bias)
    assert jnp.allclose(out, out_ref, atol=1e-5, rtol=1e-5)
    assert jnp.allclose(logdet, logdet_ref, atol=1e-5, rtol=1e-5)

    print("KERNEL_OK")
</pallas_src>

<mosaic_0001>
module attributes {stable_mosaic.version = 11 : i64} {
  func.func @planar_flow_kernel(%arg0: i32, %arg1: memref<2xf32, #tpu.memory_space<smem>>, %arg2: memref<1x128xf32, #tpu.memory_space<vmem>>, %arg3: memref<1x128xf32, #tpu.memory_space<vmem>>, %arg4: memref<32x128xf32, #tpu.memory_space<vmem>>, %arg5: memref<32x128xf32, #tpu.memory_space<vmem>>, %arg6: memref<32x1xf32, #tpu.memory_space<vmem>>) attributes {dimension_semantics = [#tpu.dimension_semantics<parallel>], iteration_bounds = array<i64: 2>, scalar_prefetch = 1 : i64, scratch_operands = 0 : i64, tpu.core_type = #tpu.core_type<tc>, window_params = [{pipeline_mode = #tpu.pipeline_mode<synchronous>, transform_indices = @transform_0, window_bounds = array<i64: 1, 128>}, {pipeline_mode = #tpu.pipeline_mode<synchronous>, transform_indices = @transform_1, window_bounds = array<i64: 1, 128>}, {transform_indices = @transform_2, window_bounds = array<i64: 32, 128>}, {transform_indices = @transform_3, window_bounds = array<i64: 32, 128>}, {transform_indices = @transform_4, window_bounds = array<i64: 32, 1>}]} {
    %c0 = arith.constant 0 : index
    %0 = memref.load %arg1[%c0] : memref<2xf32, #tpu.memory_space<smem>>
    %c1 = arith.constant 1 : index
    %1 = memref.load %arg1[%c1] : memref<2xf32, #tpu.memory_space<smem>>
    %c0_0 = arith.constant 0 : index
    %c0_1 = arith.constant 0 : index
    %2 = vector.load %arg4[%c0_0, %c0_1] : memref<32x128xf32, #tpu.memory_space<vmem>>, vector<32x128xf32>
    %c0_2 = arith.constant 0 : index
    %c0_3 = arith.constant 0 : index
    %3 = vector.load %arg2[%c0_2, %c0_3] : memref<1x128xf32, #tpu.memory_space<vmem>>, vector<1x128xf32>
    %c0_4 = arith.constant 0 : index
    %c0_5 = arith.constant 0 : index
    %4 = vector.load %arg3[%c0_4, %c0_5] : memref<1x128xf32, #tpu.memory_space<vmem>>, vector<1x128xf32>
    %5 = vector.broadcast %3 : vector<1x128xf32> to vector<32x128xf32>
    %6 = arith.mulf %2, %5 : vector<32x128xf32>
    %cst = arith.constant dense<0.000000e+00> : vector<32xf32>
    %7 = vector.multi_reduction <add>, %6, %cst [1] : vector<32x128xf32> to vector<32xf32>
    %8 = vector.shape_cast %7 : vector<32xf32> to vector<32x1xf32>
    %9 = vector.broadcast %0 : f32 to vector<32x1xf32>
    %10 = arith.addf %8, %9 : vector<32x1xf32>
    %11 = math.tanh %10 : vector<32x1xf32>
    %12 = arith.mulf %11, %11 : vector<32x1xf32>
    %cst_6 = arith.constant 1.000000e+00 : f32
    %13 = vector.broadcast %cst_6 : f32 to vector<32x1xf32>
    %14 = arith.subf %13, %12 : vector<32x1xf32>
    %15 = vector.broadcast %4 : vector<1x128xf32> to vector<32x128xf32>
    %16 = vector.broadcast %11 : vector<32x1xf32> to vector<32x128xf32>
    %17 = arith.mulf %15, %16 : vector<32x128xf32>
    %18 = arith.addf %2, %17 : vector<32x128xf32>
    %c0_7 = arith.constant 0 : index
    %c0_8 = arith.constant 0 : index
    %19 = vector.load %arg5[%c0_7, %c0_8] : memref<32x128xf32, #tpu.memory_space<vmem>>, vector<32x128xf32>
    tpu.vector_store %arg5[%c0_7, %c0_8], %18 {strides = array<i32>} : memref<32x128xf32, #tpu.memory_space<vmem>>, vector<32x128xf32>,
    %20 = vector.broadcast %1 : f32 to vector<32x1xf32>
    %21 = arith.mulf %20, %14 : vector<32x1xf32>
    %cst_9 = arith.constant 1.000000e+00 : f32
    %22 = vector.broadcast %cst_9 : f32 to vector<32x1xf32>
    %23 = arith.addf %22, %21 : vector<32x1xf32>
    %24 = math.absf %23 : vector<32x1xf32>
    %25 = math.log %24 : vector<32x1xf32>
    %c0_10 = arith.constant 0 : index
    %c0_11 = arith.constant 0 : index
    %26 = vector.load %arg6[%c0_10, %c0_11] : memref<32x1xf32, #tpu.memory_space<vmem>>, vector<32x1xf32>
    tpu.vector_store %arg6[%c0_10, %c0_11], %25 {strides = array<i32>} : memref<32x1xf32, #tpu.memory_space<vmem>>, vector<32x1xf32>,
    return
  }
  func.func @transform_0(%arg0: i32, %arg1: memref<2xf32, #tpu.memory_space<smem>>) -> (i32, i32) {
    %c0_i32 = arith.constant 0 : i32
    %c0_i32_0 = arith.constant 0 : i32
    %c0_i32_1 = arith.constant 0 : i32
    return %c0_i32, %c0_i32_0 : i32, i32
  }
  func.func @transform_1(%arg0: i32, %arg1: memref<2xf32, #tpu.memory_space<smem>>) -> (i32, i32) {
    %c0_i32 = arith.constant 0 : i32
    %c0_i32_0 = arith.constant 0 : i32
    %c0_i32_1 = arith.constant 0 : i32
    return %c0_i32, %c0_i32_0 : i32, i32
  }
  func.func @transform_2(%arg0: i32, %arg1: memref<2xf32, #tpu.memory_space<smem>>) -> (i32, i32) {
    %c0_i32 = arith.constant 0 : i32
    %c0_i32_0 = arith.constant 0 : i32
    return %arg0, %c0_i32 : i32, i32
  }
  func.func @transform_3(%arg0: i32, %arg1: memref<2xf32, #tpu.memory_space<smem>>) -> (i32, i32) {
    %c0_i32 = arith.constant 0 : i32
    %c0_i32_0 = arith.constant 0 : i32
    return %arg0, %c0_i32 : i32, i32
  }
  func.func @transform_4(%arg0: i32, %arg1: memref<2xf32, #tpu.memory_space<smem>>) -> (i32, i32) {
    %c0_i32 = arith.constant 0 : i32
    %c0_i32_0 = arith.constant 0 : i32
    return %arg0, %c0_i32 : i32, i32
  }
}

</mosaic_0001>

<bundles_post_ra>
// kernel: _planar_flow_call.1
= control target key start
LH: loop header
LB: loop body
LE: loop exit
PB: predicated region body
PF: predicated region fallthrough
CT: control target
= control target key end

     0   :  { %s878_s0 = inlined_call_operand.hbm [shape: f32[2], index: 0, kind: input, shape index: {}]   ;;  %s879_s1 = inlined_call_operand.vmem [shape: f32[1,128], index: 1, kind: input, shape index: {}]   ;;  %s880_s2 = inlined_call_operand.vmem [shape: f32[1,128], index: 2, kind: input, shape index: {}]   ;;  %s881_s3 = inlined_call_operand.hbm [shape: f32[64,128], index: 3, kind: input, shape index: {}]   ;;  %s882_s4 = inlined_call_operand.hbm [shape: f32[64,128], index: 4, kind: output, shape index: {0}]   ;;  %s883_s5 = inlined_call_operand.vmem [shape: f32[64,1], index: 5, kind: output, shape index: {1}]  }
   0x1   :  { %s533_s20 = scalar_lea.hbm %s878_s0, 16 }
   0x2   :  { %p534_p0 = scmp.ne.s32.totalorder %s878_s0, %s533_s20  ;;  %p537_p1 = scmp.lt.u32.totalorder %s533_s20, %s878_s0 }
   0x4   :  { %p539_p2 = pnand %p537_p1, %p534_p0 }
   0x6   :  { %542 = shalt.err (!%p539_p2)  }
   0x7   :  { %s643_s25 = smov [#allocation3]  }
   0x8   :  { %12 = dma.hbm_to_smem %s878_s0, 16, %s643_s25, [#allocation2] }
   0x9   :  { %617 = dma.done.wait [#allocation2], 16 }
   0xa   :  { %618 = vsyncadd [#allocation2], 4294967280 }
   0xb   :  { %14 = sfence }
   0xc   :  { %15 = vsyncpa [#allocation5], 0 }
   0xd   :  { %17 = vsyncpa [#allocation5 + $0x1], 0 }
   0xe   :  { %18 = vsyncpa [#allocation6], 0 }
   0xf   :  { %20 = vsyncpa [#allocation6 + $0x1], 0  ;;  %s692_s28 = smov 0   ;;  %s694_s29 = smov 0  }
  0x10   :  { %s696_s30 = smov 0   ;;  %s698_s6 = smov 0  }
  0x11 LB: > { %s713_s0 = sadd.s32 4294967295, %s641_s6   ;;  %s445_s7 = sadd.s32 4294967294, %s641_s6   ;;  %s641_s6 = sphi %s698_s6, %s897_s6   ;;  %s637_s30 = sphi %s696_s30, %s896_s30   ;;  %s633_s29 = sphi %s694_s29, %s895_s29   ;;  %s629_s28 = sphi %s692_s28, %s894_s28  }
  0x12   : > { %s717_s8 = sadd.s32 1, %s641_s6   ;;  %s75_s9 = sadd.s32 1, %s637_s30 }
  0x13   : > { %s72_s10 = ssub.s32 %s641_s6, %s717_s8  ;;  %p82_p3 = scmp.ne.s32.totalorder %s637_s30, %s633_s29 }
  0x14   : > { %p73_p4 = scmp.eq.s32.totalorder %s72_s10, 0  ;;  %p83_p5 = scmp.eq.s32.totalorder %s641_s6, 0 }
  0x15   : > { %p88_p6 = scmp.ne.s32.totalorder %s633_s29, %s629_s28  ;;  %p89_p7 = scmp.eq.s32.totalorder %s713_s0, 0 }
  0x16   : > { %s729_s11 = scalar_select %p73_p4, %s637_s30, %s75_s9  }
  0x17   : > { %p731_p8 = por %p83_p5, %p82_p3  ;;  %p735_p9 = por %p89_p7, %p88_p6 }
  0x18   : > { %p112_p10 = scmp.eq.s32.totalorder %s713_s0, 1  ;;  %p118_p11 = scmp.eq.s32.totalorder %s445_s7, 1 }
  0x19   : > { %p478_p13 = scmp.lt.s32.totalorder %s641_s6, 2  ;;  %s170_s16 = sand.u32 1, %s637_s30  }
  0x1a   : > { %p742_p0 = por %p112_p10, %p82_p3  ;;  %p746_p1 = por %p118_p11, %p88_p6 }
  0x1b   : > { %s464_s17 = sshll.u32 %s641_s6, 9  ;;  %s448_s18 = sshll.u32 %s170_s16, 5 }
  0x1c   : > { %s887_s14 = scalar_select %p742_p0, 1, 0 }
  0x1d   : > { %s888_s15 = scalar_select %p746_p1, 1, 0 }
  0x1e   : > { %s755_s21 = scalar_lea.hbm %s881_s3, %s464_s17  ;;  %s174_s22 = scalar_lea.vmem [#allocation4], %s448_s18 }
  0x1f   : > { %s181_s23 = sshll.u32 %s174_s22, 4  ;;  %p759_p2 = pnand %p478_p13, %p731_p8  ;;  %s763_s23 = int_to_ptr.vmem [resolvable:$true] %s181_s23 }
  0x20   : > { %s765_s25 = scalar_lea.sflag [#allocation5], %s170_s16  ;;  %s543_s26 = scalar_lea.hbm %s755_s21, 512 }
  0x21   : > { %p544_p3 = scmp.ne.s32.totalorder %s755_s21, %s543_s26  ;;  %p545_p4 = pneg %p759_p2 }
  0x22   : > { %s548_s9 = scalar_lea.hbm %s881_s3, 1024  ;;  %p549_p7 = scmp.lt.u32.totalorder %s755_s21, %s881_s3 }
  0x23   : > { %p546_p5 = pnand %p545_p4, %p544_p3  ;;  %p550_p8 = scmp.lt.u32.totalorder %s548_s9, %s543_s26 }
  0x24   : > { %p552_p11 = scmp.lt.u32.totalorder %s543_s26, %s755_s21 }
  0x25   : > { %p547_p6 = pneg %p546_p5  ;;  %p551_p10 = por %p550_p8, %p549_p7 }
  0x27   : > { %p553_p13 = por %p552_p11, %p551_p10 }
  0x29   : > { %p554_p12 = pnand %p553_p13, %p547_p6 }
  0x2b   : > { %557 = shalt.err (!%p554_p12)
}
  0x2c   : > { %s558_s16 = scalar_lea.vmem %s763_s23, 512  ;;  %s644_s17 = smov [#allocation4]  }
  0x2d   : > { %p559_p3 = scmp.ne.s32.totalorder %s763_s23, %s558_s16  ;;  %s563_s18 = sshll.u32 %s644_s17, 4  ;;  %s564_s18 = int_to_ptr.vmem [resolvable:$false] %s563_s18 }
  0x2e   : > { %s565_s19 = scalar_lea.vmem %s564_s18, 1024  ;;  %p566_p0 = scmp.lt.s32.totalorder %s763_s23, %s564_s18 }
  0x2f   : > { %p561_p5 = pnand %p559_p3, %p545_p4  ;;  %p567_p7 = scmp.lt.s32.totalorder %s565_s19, %s558_s16 }
  0x31   : > { %p562_p1 = pneg %p561_p5  ;;  %p568_p8 = por %p567_p7, %p566_p0 }
  0x33   : > { %p569_p10 = pnand %p568_p8, %p562_p1 }
  0x35   : > { %572 = shalt.err (!%p569_p10)
}
  0x36   : > { %s645_s20 = smov 128   ;;  %s646_s22 = smov 8  }
  0x37   : > { %473 = dma.hbm_to_vmem [thread:$0]  (!%p759_p2), %s755_s21, 512, %s763_s23, %s765_s25, %s645_s20, %s645_s20, %s646_s22  }
  0x38   : > { %p451_p12 = scmp.ge.s32.totalorder %s641_s6, 1  ;;  %p189_p4 = scmp.lt.s32.totalorder %s641_s6, 3 }
  0x3a   : > { %p190_p6 = pnand %p451_p12, %p189_p4 }
  0x3b   : > { %s796_s26 = sand.u32 (!%p190_p6), 1, %s633_s29  }
  0x3c   : > { %193 = sbr.rel (%p190_p6) target bundleno = 268 (0x10c), region = 32  ;;  %s452_s27 = sshll.u32 (!%p190_p6), %s796_s26, 5 }
  0x3d   : > { %s196_s7 = scalar_lea.sflag (!%p190_p6), [#allocation5], %s796_s26  ;;  %s199_s9 = scalar_lea.vmem (!%p190_p6), [#allocation4], %s452_s27 }
  0x43   : > { %620 = dma.done.wait (%p735_p9), %s196_s7, 512  }
  0x44   : > { %622 = vsyncadd (%p735_p9), %s196_s7, 4294966784  ;;  %v239_v0 = vld [vmem:[%s199_s9] sm:$0xff]  ;;  %v241_v2 = vld [vmem:[%s199_s9 + $0x10] sm:$0xff]  ;;  %s237_s24 = sld [smem:[#allocation3]]  ;;  %s456_s13 = sld [smem:[#allocation3 + $0x1]] }
  0x45   : > { %v457_v1 = vld [vmem:[%s879_s1] ss:$0 sm:$0xff]  ;;  %v240_v5 = vld [vmem:[%s199_s9 + $0x8] sm:$0xff]  ;;  %v242_v6 = vld [vmem:[%s199_s9 + $0x18] sm:$0xff]  ;;  %s465_s12 = sshll.u32 %s713_s0, 9  ;;  %s221_s16 = scalar_lea.vmem [#allocation7], %s452_s27 }
  0x46   : > { %v251_v3 = vmul.f32 %v457_v1, %v239_v0  ;;  %v253_v4 = vmul.f32 %v457_v1, %v241_v2  ;;  %v252_v7 = vmul.f32 %v457_v1, %v240_v5  ;;  %v254_v8 = vmul.f32 %v457_v1, %v242_v6  ;;  %v458_v18 = vld [vmem:[%s880_s2] ss:$0 sm:$0xff]  ;;  %s343_s17 = sshll.u32 %s221_s16, 4  ;;  %s454_s18 = sshll.u32 %s713_s0, 2  ;;  %s821_s17 = int_to_ptr.vmem [resolvable:$true] %s343_s17 }
  0x47   : > { %s819_s22 = scalar_lea.hbm %s882_s4, %s465_s12  ;;  %p825_p9 = scmp.lt.s32.totalorder %s454_s18, 7 }
  0x48   : > { %255 = vadd.xlane.f32.xlu0 %v251_v3  ;;  %259 = vadd.xlane.f32.xlu1 %v253_v4  ;;  %s325_s7 = scalar_lea.sflag [#allocation6], %s796_s26  ;;  %s573_s9 = scalar_lea.vmem %s821_s17, 512 }
  0x49   : > { %p574_p0 = scmp.ne.s32.totalorder %s821_s17, %s573_s9  ;;  %p891_p1 = scmp.ne.s32.totalorder %s887_s14, 0 }
  0x4a   : > { %v263_v9 = vstv %s237_s24  ;;  %v298_v23 = vstv %s456_s13  ;;  %s647_s21 = smov [#allocation7]  }
  0x4b   : > { %p575_p2 = pnand %p574_p0, %p891_p1  ;;  %s577_s23 = sshll.u32 %s647_s21, 4  ;;  %s578_s23 = int_to_ptr.vmem [resolvable:$false] %s577_s23 }
  0x4c   : > { %257 = vadd.xlane.f32.xlu0 %v252_v7  ;;  %261 = vadd.xlane.f32.xlu1 %v254_v8  ;;  %s579_s24 = scalar_lea.vmem %s578_s23, 1024  ;;  %p580_p13 = scmp.lt.s32.totalorder %s821_s17, %s578_s23 }
  0x4d   : > { %p576_p11 = pneg %p575_p2  ;;  %p581_p3 = scmp.lt.s32.totalorder %s579_s24, %s573_s9 }
  0x4f   : > { %p582_p5 = por %p581_p3, %p580_p13 }
  0x51   : > { %p583_p7 = pnand %p582_p5, %p576_p11 }
  0xd5   : > { %v256_v10 = vpop.xlane.xlu0 %255  ;;  %v260_v11 = vpop.xlane.xlu1 %259 }
  0xd6   : > { %v264_v12 = vadd.f32 %v263_v9, %v256_v10  ;;  %v266_v13 = vadd.f32 %v263_v9, %v260_v11 }
  0xd8   : > { %517 = vtanh.f32 %v264_v12 }
  0xd9   : > { %519 = vtanh.f32 %v266_v13  ;;  %v258_v14 = vpop.xlane.xlu0 %257  ;;  %v262_v15 = vpop.xlane.xlu1 %261 }
  0xda   : > { %v265_v16 = vadd.f32 %v263_v9, %v258_v14  ;;  %v267_v17 = vadd.f32 %v263_v9, %v262_v15 }
  0xdc   : > { %521 = vtanh.f32 %v265_v16 }
  0xdd   : > { %523 = vtanh.f32 %v267_v17 }
  0xe2   : > { %v518_v19 = vpop.eup %517 }
  0xe3   : > { %v520_v20 = vpop.eup %519  ;;  %v272_v21 = vmul.f32 %v518_v19, %v518_v19  ;;  %v286_v22 = vmul.f32 %v518_v19, %v458_v18 }
  0xe4   : > { %v274_v24 = vmul.f32 %v520_v20, %v520_v20  ;;  %v288_v25 = vmul.f32 %v520_v20, %v458_v18 }
  0xe5   : > { %v276_v26 = vsub.f32 1.0, %v272_v21  ;;  %v290_v27 = vadd.f32 %v286_v22, %v239_v0 }
  0xe6   : > { %v522_v28 = vpop.eup %521  ;;  %v278_v29 = vsub.f32 1.0, %v274_v24  ;;  %v292_v30 = vadd.f32 %v288_v25, %v241_v2 }
  0xe7   : > { %v524_v31 = vpop.eup %523  ;;  %294 = vst [vmem:[%s221_s16] sm:$0xff] %v290_v27  ;;  %v299_v32 = vmul.f32 %v298_v23, %v276_v26  ;;  %v273_v33 = vmul.f32 %v522_v28, %v522_v28  ;;  %v287_v34 = vmul.f32 %v522_v28, %v458_v18 }
  0xe8   : > { %296 = vst [vmem:[%s221_s16 + $0x10] sm:$0xff] %v292_v30  ;;  %v301_v35 = vmul.f32 %v298_v23, %v278_v29  ;;  %v275_v36 = vmul.f32 %v524_v31, %v524_v31  ;;  %v289_v37 = vmul.f32 %v524_v31, %v458_v18 }
  0xe9   : > { %v303_v38 = vadd.f32 1.0, %v299_v32  ;;  %v277_v39 = vsub.f32 1.0, %v273_v33  ;;  %v291_v40 = vadd.f32 %v287_v34, %v240_v5 }
  0xea   : > { %v305_v41 = vadd.f32 1.0, %v301_v35  ;;  %v279_v42 = vsub.f32 1.0, %v275_v36  ;;  %v293_v43 = vadd.f32 %v289_v37, %v242_v6 }
  0xeb   : > { %v307_v44 = vand.u32 2147483647, %v303_v38  ;;  %295 = vst [vmem:[%s221_s16 + $0x8] sm:$0xff] %v291_v40  ;;  %v300_v45 = vmul.f32 %v298_v23, %v277_v39 }
  0xec   : > { %v309_v46 = vand.u32 2147483647, %v305_v41  ;;  %297 = vst [vmem:[%s221_s16 + $0x18] sm:$0xff] %v293_v43  ;;  %v302_v47 = vmul.f32 %v298_v23, %v279_v42 }
  0xed   : > { %525 = vlog2.f32 %v307_v44  ;;  %v304_v48 = vadd.f32 1.0, %v300_v45 }
  0xee   : > { %586 = shalt.err (!%p583_p7)
}
  0xef   : > { %s587_s13 = scalar_lea.hbm %s819_s22, 512  ;;  %s591_s12 = scalar_lea.hbm %s882_s4, 1024 }
  0xf0   : > { %p588_p8 = scmp.ne.s32.totalorder %s819_s22, %s587_s13  ;;  %p592_p4 = scmp.lt.u32.totalorder %s819_s22, %s882_s4 }
  0xf1   : > { %p593_p6 = scmp.lt.u32.totalorder %s591_s12, %s587_s13  ;;  %p595_p2 = scmp.lt.u32.totalorder %s587_s13, %s819_s22 }
  0xf2   : > { %p589_p10 = pnand %p588_p8, %p891_p1 }
  0xf3   : > { %p594_p0 = por %p593_p6, %p592_p4 }
  0xf4   : > { %p590_p12 = pneg %p589_p10 }
  0xf5   : > { %p596_p11 = por %p595_p2, %p594_p0 }
  0xf7   : > { %p597_p13 = pnand %p596_p11, %p590_p12 }
  0xf9   : > { %600 = shalt.err (!%p597_p13)
}
  0xfa   : > { %s648_s20 = smov 128   ;;  %s649_s9 = smov 8   ;;  %v306_v49 = vadd.f32 1.0, %v302_v47  ;;  %v308_v50 = vand.u32 2147483647, %v304_v48  ;;  %527 = vlog2.f32 %v309_v46  ;;  %v526_v52 = vpop.eup %525  ;;  %vm319_vm0 = vcmask 7168  }
  0xfb   : > { %468 = dma.vmem_to_hbm [thread:$0]  (%p891_p1), %s821_s17, 512, %s819_s22, %s325_s7, %s648_s20, %s648_s20, %s649_s9   ;;  %v312_v53 = vmul.f32 0.6931472, %v526_v52 }
  0xfc   : > { %s899_s18 = smov (!%p825_p9, %s454_s18), 7  ;;  %v310_v51 = vand.u32 2147483647, %v306_v49  ;;  %529 = vlog2.f32 %v308_v50 }
  0xfd   : > { %s455_s21 = sshll.u32 %s899_s18, 3 }
  0xfe   : > { %531 = vlog2.f32 %v310_v51  ;;  %s235_s13 = scalar_lea.vmem %s883_s5, %s455_s21 }
  0xff   : > { %320 = vst.msk [vmem:[%s235_s13] sm:$0xff] %vm319_vm0, %v312_v53 }
 0x104   : > { %v528_v54 = vpop.eup %527 }
 0x105   : > { %v316_v58 = vmul.f32 0.6931472, %v528_v54 }
 0x106   : > { %v530_v55 = vpop.eup %529 }
 0x107   : > { %v314_v57 = vmul.f32 0.6931472, %v530_v55  ;;  %322 = vst.msk [vmem:[%s235_s13 + $0x10] sm:$0xff] %vm319_vm0, %v316_v58 }
 0x108   : > { %v532_v56 = vpop.eup %531 }
 0x109   : > { %v318_v59 = vmul.f32 0.6931472, %v532_v56  ;;  %321 = vst.msk [vmem:[%s235_s13 + $0x8] sm:$0xff] %vm319_vm0, %v314_v57 }
 0x10b   : > { %323 = vst.msk [vmem:[%s235_s13 + $0x18] sm:$0xff] %vm319_vm0, %v318_v59 }
 0x10c PF: > { %s362_s0 = sand.u32 1, %s629_s28   ;;  %p892_p9 = scmp.ne.s32.totalorder %s888_s15, 0 }
 0x10d   : > { %p893_p1 = scmp.ge.s32.totalorder %s641_s6, 2  ;;  %s363_s14 = scalar_lea.sflag [#allocation6], %s362_s0 }
 0x10f   : > { %p475_p3 = pnand %p893_p1, %p892_p9 }
 0x111   : > { %624 = dma.done.wait (!%p475_p3), %s363_s14, 512  }
 0x112   : > { %626 = vsyncadd (!%p475_p3), %s363_s14, 4294966784  ;;  %p23_p5 = scmp.ge.s32.totalorder %s717_s8, 4   ;;  %s894_s28 = smov %s633_s29 }
 0x113   : > { %s895_s29 = smov %s637_s30  ;;  %s896_s30 = smov %s729_s11 }
 0x114   : > { %s897_s6 = smov %s717_s8  ;;  %25 = sbr.rel (!%p23_p5) target bundleno = 17 (0x11), region = 89 }
 0x11b   :  { %376 = vsyncpa [#allocation5], 1 }
 0x11c   :  { %378 = vsyncpa [#allocation5 + $0x1], 1 }
 0x11d   :  { %379 = vsyncpa [#allocation6], 1 }
 0x11e   :  { %381 = vsyncpa [#allocation6 + $0x1], 1 }

</bundles_post_ra>
